<compile_context>
chip_gen: v7x
topology: tpu7x:2x2x1
jax: 0.10.0
libtpu: 0.0.40
codegen_flags: <defaults>
</compile_context>

<pallas_src>
import functools
import math

import numpy as np
import jax
import jax.numpy as jnp
from jax.experimental import pallas as pl
from jax.experimental.pallas import tpu as pltpu

_THRESHOLD = 25.0
# grad_mag = 9*sqrt(gx^2+gy^2) > 25  <=>  gx^2 + gy^2 > (25/9)^2
_THRESH_SQ = (_THRESHOLD / 9.0) ** 2


# ----------------------------------------------------------------------------
# Host-side construction of the composed banded convolution operators.
# ----------------------------------------------------------------------------
def _band_matrix(n, taps, pad):
    """Left-multiply matrix of a zero-padded 'same' cross-correlation:
    (M @ v)[i] = sum_d taps[d] * v[i + d - pad]  ->  M[i, j] = taps[j - i + pad]."""
    k = len(taps)
    m = np.zeros((n, n), dtype=np.float32)
    for i in range(n):
        for d in range(k):
            j = i + d - pad
            if 0 <= j < n:
                m[i, j] = taps[d]
    return m


def _make_operators(H, W, nb):
    """Composed (gaussian ∘ sobel) operators.

    Returns A2 = [Ax; Ay] of shape (2H, H) and block-diagonal Bx, By of shape
    (nb*W, nb*W) such that gx = Ax @ xsum @ Bx, gy = Ay @ xsum @ By for nb
    lane-packed images (columns [n*W, (n+1)*W) belong to packed image n)."""
    # 1-D Gaussian factor: the torch 5x5 gaussian is exactly outer(f, f).
    ks = 5
    mean = (ks - 1) / 2.0
    a = np.exp(-((np.arange(ks, dtype=np.float64) - mean) ** 2) / 2.0)
    f = (a / a.sum()).astype(np.float32)
    s121 = np.array([1.0, 2.0, 1.0], np.float32)   # sobel smoothing factor
    s101 = np.array([1.0, 0.0, -1.0], np.float32)  # sobel derivative factor

    # Vertical (left-multiply) operators, composed: sobel_factor @ gauss.
    g_v = _band_matrix(H, f, 2)
    ax = (_band_matrix(H, s121, 1) @ g_v).astype(np.float32)   # grad_x vertical part
    ay = (_band_matrix(H, s101, 1) @ g_v).astype(np.float32)   # grad_y vertical part
    a2 = np.concatenate([ax, ay], axis=0)                      # (2H, H)

    # Horizontal (right-multiply) operators (transpose of the left form),
    # composed gaussian-first then sobel.
    g_h = _band_matrix(W, f, 2).T
    bx = (g_h @ _band_matrix(W, s101, 1).T).astype(np.float32)  # grad_x horizontal
    by = (g_h @ _band_matrix(W, s121, 1).T).astype(np.float32)  # grad_y horizontal

    def blockdiag(b):
        out = np.zeros((nb * W, nb * W), dtype=np.float32)
        for n in range(nb):
            out[n * W:(n + 1) * W, n * W:(n + 1) * W] = b
        return out

    return a2, blockdiag(bx), blockdiag(by)


def _choose_images_per_block(N, W):
    """How many batch images to pack into the lane axis of one grid step."""
    # Target ~512 lanes per grid step (measured HBM-roofline sweet spot); this also
    # caps the block-diagonal horizontal operators at (512, 512).
    nb = max(1, min(512 // max(W, 1), N))
    if N >= 2:
        # Keep grid length >= 2 so both v7x TensorCores get work.
        nb = min(nb, max(1, N // 2))
    return nb


# ----------------------------------------------------------------------------
# Pallas kernel: 3 MXU matmuls + squared-threshold compare, int8 mask out.
# ----------------------------------------------------------------------------
def _edges_kernel(x_ref, a2_ref, bx_ref, by_ref, o_ref):
    H = a2_ref.shape[1]
    xs = x_ref[0]                                                # (H, L) bf16
    # Fused vertical pass: one matmul computes both sobel orientations.
    t = jnp.dot(a2_ref[...], xs, preferred_element_type=jnp.float32)   # (2H, L)
    tx = t[:H].astype(jnp.bfloat16)
    ty = t[H:].astype(jnp.bfloat16)
    gx = jnp.dot(tx, bx_ref[...], preferred_element_type=jnp.float32)  # (H, L)
    gy = jnp.dot(ty, by_ref[...], preferred_element_type=jnp.float32)  # (H, L)
    mag2 = gx * gx + gy * gy
    o_ref[0] = (mag2 > _THRESH_SQ).astype(jnp.int8)


@functools.lru_cache(maxsize=None)
def _build_edges_fn(N, H, W):
    """Build (once per shape) a jitted edges function with baked-in operators."""
    nb = _choose_images_per_block(N, W)
    L = nb * W
    n_groups = -(-N // nb)          # ceil(N / nb)
    n_pad = n_groups * nb

    a2_np, bx_np, by_np = _make_operators(H, W, nb)
    # Device-resident bf16 constants: uploaded once, reused for every call.
    a2 = jnp.asarray(a2_np, jnp.bfloat16)
    bx = jnp.asarray(bx_np, jnp.bfloat16)
    by = jnp.asarray(by_np, jnp.bfloat16)

    kernel_call = pl.pallas_call(
        _edges_kernel,
        out_shape=jax.ShapeDtypeStruct((n_groups, H, L), jnp.int8),
        grid_spec=pltpu.PrefetchScalarGridSpec(
            num_scalar_prefetch=0,
            grid=(n_groups,),
            in_specs=[
                pl.BlockSpec((1, H, L), lambda i: (i, 0, 0)),      # packed input slab
                pl.BlockSpec((2 * H, H), lambda i: (0, 0)),        # A2 = [Ax; Ay]
                pl.BlockSpec((L, L), lambda i: (0, 0)),            # Bx (block-diag)
                pl.BlockSpec((L, L), lambda i: (0, 0)),            # By (block-diag)
            ],
            out_specs=pl.BlockSpec((1, H, L), lambda i: (i, 0, 0)),
        ),
        compiler_params=pltpu.CompilerParams(
            dimension_semantics=("parallel",),
            vmem_limit_bytes=32 * 1024 * 1024,
        ),
    )

    def fn(x):
        # Channel sum (gaussian weight is shared across channels), f32 for accuracy.
        xsum = jnp.sum(x.astype(jnp.float32), axis=1)              # (N, H, W)
        if n_pad != N:
            xsum = jnp.pad(xsum, ((0, n_pad - N), (0, 0), (0, 0)))
        # Lane-pack nb images per group: (n_pad,H,W) -> (G, H, nb*W).  When nb == 1
        # the transpose is a no-op reshape, so no extra layout pass is paid.
        xs = xsum.reshape(n_groups, nb, H, W)
        xs = jnp.transpose(xs, (0, 2, 1, 3)).reshape(n_groups, H, L)
        xs = xs.astype(jnp.bfloat16)

        m = kernel_call(xs, a2, bx, by)                            # (G, H, L) int8
        # Unpack lanes back to NCHW, drop batch padding, present as bool.
        m = m.reshape(n_groups, H, nb, W)
        m = jnp.transpose(m, (0, 2, 1, 3)).reshape(n_pad, H, W)[:N]
        return m.reshape(N, 1, H, W).astype(jnp.bool_)

    return jax.jit(fn)


def edges(x: jax.Array) -> jax.Array:
    """x: (N, 3, H, W) float -> bool (N, 1, H, W), matching Edges.forward."""
    N, C, H, W = x.shape
    assert C == 3, "Edges expects 3-channel input"
    return _build_edges_fn(int(N), int(H), int(W))(x)


# ----------------------------------------------------------------------------
# Direct (non-separable) pure-JAX f32 reference, used only for a self-check.
# ----------------------------------------------------------------------------
def _make_2d_filters():
    ks = 5
    mean = (ks - 1) / 2.0
    xs = np.arange(ks, dtype=np.float64)
    xg = np.tile(xs, (ks, 1))
    yg = xg.T
    g = (1.0 / (2.0 * math.pi)) * np.exp(-((xg - mean) ** 2 + (yg - mean) ** 2) / 2.0)
    g = (g / g.sum()).astype(np.float32)
    sh = np.array([[1, 0, -1], [2, 0, -2], [1, 0, -1]], np.float32)
    return g, sh, sh.T.copy()


def _conv2d_same(img, kern):
    kh, kw = kern.shape
    ph, pw = kh // 2, kw // 2
    H, W = img.shape[-2:]
    p = jnp.pad(img, [(0, 0)] * (img.ndim - 2) + [(ph, ph), (pw, pw)])
    out = jnp.zeros_like(img)
    for di in range(kh):
        for dj in range(kw):
            w = float(kern[di, dj])
            if w != 0.0:
                out = out + w * p[..., di:di + H, dj:dj + W]
    return out


def _edges_reference(x):
    g, sh, sv = _make_2d_filters()
    xsum = jnp.sum(x.astype(jnp.float32), axis=1)          # (N, H, W)
    blurred = _conv2d_same(xsum, g)
    gx = 3.0 * _conv2d_same(blurred, sh)
    gy = 3.0 * _conv2d_same(blurred, sv)
    mag = 3.0 * jnp.sqrt(gx * gx + gy * gy)                 # (N, H, W)
    return mag[:, None], mag[:, None] > _THRESHOLD


if __name__ == "__main__":
    key = jax.random.PRNGKey(0)
    # N=5 exercises lane-packing (nb=2), batch padding (pad to 6) and a grid of 3.
    N, H, W = 5, 16, 16
    x = jax.random.normal(key, (N, 3, H, W), dtype=jnp.float32) * 8.0

    mask = edges(x)
    jax.block_until_ready(mask)

    assert mask.shape == (N, 1, H, W)
    assert mask.dtype == jnp.bool_

    # Tolerant self-check vs. the direct f32 reference: pixels whose gradient
    # magnitude sits within 3.0 of the threshold are exempt (bf16 MXU operands
    # + composed banded matmuls shift values near the decision boundary; typical
    # |Δmag| is well under 1, so the band is generous).
    mag_ref, mask_ref = _edges_reference(x)
    mag_ref = np.asarray(mag_ref)
    mask_ref = np.asarray(mask_ref)
    got = np.asarray(mask)
    near_threshold = np.abs(mag_ref - _THRESHOLD) < 3.0
    assert np.all((got == mask_ref) | near_threshold), "edge mask mismatch away from threshold"

    # Second call reuses the cached jitted function (operators stay on device).
    mask2 = edges(x)
    jax.block_until_ready(mask2)
    assert bool(jnp.array_equal(mask2, mask))

    print("KERNEL_OK")
</pallas_src>

<mosaic_0001>
module attributes {stable_mosaic.version = 11 : i64} {
  func.func @_edges_kernel(%arg0: i32, %arg1: memref<1x16x32xbf16, #tpu.memory_space<vmem>>, %arg2: memref<32x16xbf16, #tpu.memory_space<vmem>>, %arg3: memref<32x32xbf16, #tpu.memory_space<vmem>>, %arg4: memref<32x32xbf16, #tpu.memory_space<vmem>>, %arg5: memref<1x16x32xi8, #tpu.memory_space<vmem>>) attributes {dimension_semantics = [#tpu.dimension_semantics<parallel>], iteration_bounds = array<i64: 3>, scalar_prefetch = 0 : i64, scratch_operands = 0 : i64, tpu.core_type = #tpu.core_type<tc>, window_params = [{transform_indices = @transform_0, window_bounds = array<i64: 1, 16, 32>}, {pipeline_mode = #tpu.pipeline_mode<synchronous>, transform_indices = @transform_1, window_bounds = array<i64: 32, 16>}, {pipeline_mode = #tpu.pipeline_mode<synchronous>, transform_indices = @transform_2, window_bounds = array<i64: 32, 32>}, {pipeline_mode = #tpu.pipeline_mode<synchronous>, transform_indices = @transform_3, window_bounds = array<i64: 32, 32>}, {transform_indices = @transform_4, window_bounds = array<i64: 1, 16, 32>}]} {
    %c0 = arith.constant 0 : index
    %c0_0 = arith.constant 0 : index
    %c0_1 = arith.constant 0 : index
    %0 = vector.load %arg1[%c0, %c0_0, %c0_1] : memref<1x16x32xbf16, #tpu.memory_space<vmem>>, vector<1x16x32xbf16>
    %1 = vector.shape_cast %0 : vector<1x16x32xbf16> to vector<16x32xbf16>
    %c0_2 = arith.constant 0 : index
    %c0_3 = arith.constant 0 : index
    %2 = vector.load %arg2[%c0_2, %c0_3] : memref<32x16xbf16, #tpu.memory_space<vmem>>, vector<32x16xbf16>
    %cst = arith.constant dense<0.000000e+00> : vector<32x32xf32>
    %3 = tpu.matmul %2, %1, %cst {dimension_numbers = #tpu.dot_dimension_numbers<[1], [0], [0], [1], [0, 0, 1, 1], [], []>} : vector<32x16xbf16>, vector<16x32xbf16>, vector<32x32xf32> -> vector<32x32xf32>
    %4 = vector.extract_strided_slice %3 {offsets = [0, 0], sizes = [16, 32], strides = [1, 1]} : vector<32x32xf32> to vector<16x32xf32>
    %5 = arith.truncf %4 : vector<16x32xf32> to vector<16x32xbf16>
    %6 = vector.extract_strided_slice %3 {offsets = [16, 0], sizes = [16, 32], strides = [1, 1]} : vector<32x32xf32> to vector<16x32xf32>
    %7 = arith.truncf %6 : vector<16x32xf32> to vector<16x32xbf16>
    %c0_4 = arith.constant 0 : index
    %c0_5 = arith.constant 0 : index
    %8 = vector.load %arg3[%c0_4, %c0_5] : memref<32x32xbf16, #tpu.memory_space<vmem>>, vector<32x32xbf16>
    %cst_6 = arith.constant dense<0.000000e+00> : vector<16x32xf32>
    %9 = tpu.matmul %5, %8, %cst_6 {dimension_numbers = #tpu.dot_dimension_numbers<[1], [0], [0], [1], [0, 0, 1, 1], [], []>} : vector<16x32xbf16>, vector<32x32xbf16>, vector<16x32xf32> -> vector<16x32xf32>
    %c0_7 = arith.constant 0 : index
    %c0_8 = arith.constant 0 : index
    %10 = vector.load %arg4[%c0_7, %c0_8] : memref<32x32xbf16, #tpu.memory_space<vmem>>, vector<32x32xbf16>
    %cst_9 = arith.constant dense<0.000000e+00> : vector<16x32xf32>
    %11 = tpu.matmul %7, %10, %cst_9 {dimension_numbers = #tpu.dot_dimension_numbers<[1], [0], [0], [1], [0, 0, 1, 1], [], []>} : vector<16x32xbf16>, vector<32x32xbf16>, vector<16x32xf32> -> vector<16x32xf32>
    %12 = arith.mulf %9, %9 : vector<16x32xf32>
    %13 = arith.mulf %11, %11 : vector<16x32xf32>
    %14 = arith.addf %12, %13 : vector<16x32xf32>
    %cst_10 = arith.constant 7.71604919 : f32
    %15 = vector.broadcast %cst_10 : f32 to vector<16x32xf32>
    %16 = arith.cmpf ogt, %14, %15 : vector<16x32xf32>
    %17 = arith.extui %16 : vector<16x32xi1> to vector<16x32xi8>
    %c0_11 = arith.constant 0 : index
    %c0_12 = arith.constant 0 : index
    %c0_13 = arith.constant 0 : index
    %18 = vector.load %arg5[%c0_11, %c0_12, %c0_13] : memref<1x16x32xi8, #tpu.memory_space<vmem>>, vector<1x16x32xi8>
    %19 = vector.shape_cast %18 : vector<1x16x32xi8> to vector<16x32xi8>
    %20 = vector.shape_cast %17 : vector<16x32xi8> to vector<1x16x32xi8>
    tpu.vector_store %arg5[%c0_11, %c0_12, %c0_13], %20 {strides = array<i32>} : memref<1x16x32xi8, #tpu.memory_space<vmem>>, vector<1x16x32xi8>,
    return
  }
  func.func @transform_0(%arg0: i32) -> (i32, i32, i32) {
    %c0_i32 = arith.constant 0 : i32
    %c0_i32_0 = arith.constant 0 : i32
    %c0_i32_1 = arith.constant 0 : i32
    return %arg0, %c0_i32, %c0_i32_0 : i32, i32, i32
  }
  func.func @transform_1(%arg0: i32) -> (i32, i32) {
    %c0_i32 = arith.constant 0 : i32
    %c0_i32_0 = arith.constant 0 : i32
    %c0_i32_1 = arith.constant 0 : i32
    return %c0_i32, %c0_i32_0 : i32, i32
  }
  func.func @transform_2(%arg0: i32) -> (i32, i32) {
    %c0_i32 = arith.constant 0 : i32
    %c0_i32_0 = arith.constant 0 : i32
    %c0_i32_1 = arith.constant 0 : i32
    return %c0_i32, %c0_i32_0 : i32, i32
  }
  func.func @transform_3(%arg0: i32) -> (i32, i32) {
    %c0_i32 = arith.constant 0 : i32
    %c0_i32_0 = arith.constant 0 : i32
    %c0_i32_1 = arith.constant 0 : i32
    return %c0_i32, %c0_i32_0 : i32, i32
  }
  func.func @transform_4(%arg0: i32) -> (i32, i32, i32) {
    %c0_i32 = arith.constant 0 : i32
    %c0_i32_0 = arith.constant 0 : i32
    %c0_i32_1 = arith.constant 0 : i32
    return %arg0, %c0_i32, %c0_i32_0 : i32, i32, i32
  }
}

</mosaic_0001>

<bundles_post_ra>
// kernel: fn.1
= control target key start
LH: loop header
LB: loop body
LE: loop exit
PB: predicated region body
PF: predicated region fallthrough
CT: control target
= control target key end

     0   :  { %s586_s15 = smov 0   ;;  %s627_s0 = inlined_call_operand.vmem [shape: bf16[3,16,32], index: 0, kind: input, shape index: {}]   ;;  %s628_s1 = inlined_call_operand.vmem [shape: bf16[32,16], index: 1, kind: input, shape index: {}]   ;;  %s629_s2 = inlined_call_operand.vmem [shape: bf16[32,32], index: 2, kind: input, shape index: {}]   ;;  %s630_s3 = inlined_call_operand.vmem [shape: bf16[32,32], index: 3, kind: input, shape index: {}]   ;;  %s631_s4 = inlined_call_operand.vmem [shape: s8[3,16,32], index: 4, kind: output, shape index: {}]  }
   0x1 LB: > { %s477_s16 = sadd.s32 4294967295, %s556_s15   ;;  %p481_p0 = scmp.ge.s32.totalorder %s556_s15, 1  ;;  %s556_s15 = sphi %s586_s15, %s14_s15  }
   0x2   : > { %p162_p1 = scmp.lt.s32.totalorder %s556_s15, 4 }
   0x4   : > { %p163_p2 = pnand %p481_p0, %p162_p1 }
   0x5   : > { %p188_p3 = scmp.lt.s32.totalorder (!%p163_p2), %s477_s16, 2  ;;  %v544_v0 = vld [vmem:[%s628_s1] sm:$0xff] (!%p163_p2)   ;;  %vm223_vm0 = vcmask (!%p163_p2), 130048   ;;  %v558_v1 = vmov (!%p163_p2), 0.0   ;;  %v545_v4 = vld [vmem:[%s628_s1 + $0x8] sm:$0xff] (!%p163_p2)   ;;  %vm559_vm1 = vmmov (!%p163_p2), 0  }
   0x6   : > { %166 = sbr.rel (%p163_p2) target bundleno = 467 (0x1d3), region = 36  ;;  %512 = vmatprep.mubr.msk.bf16.mxu0 (!%p163_p2), %vm223_vm0, %v544_v0  ;;  %516 = vmatprep.subr.bf16.mxu1 (!%p163_p2), %v558_v1  ;;  %v547_v2 = vld [vmem:[%s629_s2] sm:$0xff] (!%p163_p2)   ;;  %v548_v6 = vld [vmem:[%s630_s3 + $0x8] sm:$0xff] (!%p163_p2)   ;;  %vm297_vm2 = vcmask (!%p163_p2), 261120   ;;  %v560_v28 = vmov (!%p163_p2), 0   ;;  %vm419_vm7 = vcmask (!%p163_p2), 254976  }
   0x7   : > { %517 = vmatpush3.bf16.msra.mxu1 (!%p163_p2), %v547_v2  ;;  %v546_v5 = vld [vmem:[%s630_s3] sm:$0xff] (!%p163_p2)   ;;  %v549_v7 = vld [vmem:[%s629_s2 + $0x8] sm:$0xff] (!%p163_p2)   ;;  %520 = vmatprep.mubr.msk.bf16.mxu1 (!%p163_p2), %vm559_vm1, %v558_v1 }
   0x8   : > { %518 = vmatprep.subr.bf16.mxu1 (!%p163_p2), %v558_v1 }
   0xb   : > { %519 = vmatpush3.bf16.msra.mxu1 (!%p163_p2), %v549_v7 }
   0xd   : > { %s633_s16 = smov (!%p188_p3, %s477_s16), 2 }
   0xe   : > { %s499_s19 = sshll.u32 %s633_s16, 3  ;;  %s500_s7 = sshll.u32 %s633_s16, 2 }
   0xf   : > { %s192_s24 = scalar_lea.vmem %s627_s0, %s499_s19  ;;  %s197_s10 = scalar_lea.vmem %s631_s4, %s500_s7 }
  0x10   : > { %v543_v3 = vld [vmem:[%s192_s24] sm:$0xff]  }
  0x11   : > { %510 = vmatprep.subr.bf16.mxu0 %v543_v3 }
  0x12   : > { %511 = vmatpush3.bf16.msra.mxu0 %v543_v3 }
  0x13   : > { %524 = vmatprep.subr.bf16.mxu0 %v558_v1 }
  0x15   : > { %513 = vmatmul.mubr.msk.bf16.vlgmr.msra.gmra.mrb[0].mxu0 %vm223_vm0, %v545_v4 }
  0x16   : > { %525 = vmatpush3.bf16.msra.mxu0 %v546_v5  ;;  %528 = vmatprep.mubr.msk.bf16.mxu0 %vm559_vm1, %v558_v1 }
  0x17   : > { %526 = vmatprep.subr.bf16.mxu0 %v558_v1 }
  0x1a   : > { %527 = vmatpush3.bf16.msra.mxu0 %v548_v6 }
  0xe8   : > { %v514_v8 = vpop.f32.mrb[0].mxu0 }
  0xe9   : > { %v264_v9 = vpop.f32.mrb[1].mxu0 }
  0xea   : > { %v515_v10 = vpop.f32.mrb[2].mxu0 }
  0xeb   : > { %v280_v11 = vpack.c.bf16 %v515_v10, %v514_v8  ;;  %v267_v12 = vpop.f32.mrb[3].mxu0 }
  0xec   : > { %v279_v13 = vpack.c.bf16 %v267_v12, %v264_v9 }
  0xed   : > { %529 = vmatmul.mubr.msk.bf16.vlgmr.msra.gmra.mrb[4].mxu0 %vm297_vm2, %v280_v11 }
  0xee   : > { %521 = vmatmul.mubr.msk.bf16.vlgmr.msra.gmra.mrb[0].mxu1 %vm297_vm2, %v279_v13 }
 0x1c0   : > { %v395_v14 = vpop.f32.mrb[4].mxu0 }
 0x1c1   : > { %v404_v15 = vmul.f32 %v395_v14, %v395_v14  ;;  %v335_v16 = vpop.f32.mrb[0].mxu1  ;;  %v530_v17 = vpop.f32.mrb[5].mxu0 }
 0x1c2   : > { %v402_v18 = vmul.f32 %v335_v16, %v335_v16  ;;  %v522_v19 = vpop.f32.mrb[1].mxu1  ;;  %v398_v20 = vpop.f32.mrb[6].mxu0 }
 0x1c3   : > { %v405_v21 = vmul.f32 %v398_v20, %v398_v20  ;;  %v338_v22 = vpop.f32.mrb[2].mxu1  ;;  %v531_v23 = vpop.f32.mrb[7].mxu0 }
 0x1c4   : > { %v406_v24 = vadd.f32 %v404_v15, %v402_v18  ;;  %v403_v25 = vmul.f32 %v338_v22, %v338_v22  ;;  %v523_v26 = vpop.f32.mrb[3].mxu1 }
 0x1c6   : > { %v407_v27 = vadd.f32 %v405_v21, %v403_v25  ;;  %vm408_vm3 = vcmp.gt.f32.partialorder %v406_v24, 7.716049 }
 0x1c8   : > { %vm409_vm4 = vcmp.gt.f32.partialorder %v407_v27, 7.716049 }
 0x1c9   : > { %vm410_vm5 = vmpackc.low %vm409_vm4, %vm408_vm3 }
 0x1ca   : > { %vm411_vm6 = vmpackc.even %vm410_vm5, %vm410_vm5 }
 0x1cb   : > { %v412_v29 = vsel %vm411_vm6, 16843009, %v560_v28 }
 0x1cc   : > { %v413_v30 = vunpack.c.0.s8 %v412_v29  ;;  %v414_v31 = vunpack.c.1.s8 %v412_v29 }
 0x1ce   : > { %v415_v32 = vpack.c.b16 %v413_v30, %v413_v30  ;;  %v417_v33 = vpack.c.b16 %v414_v31, %v414_v31 }
 0x1d0   : > { %v416_v34 = vpack.c.b8 %v415_v32, %v415_v32  ;;  %v418_v35 = vpack.c.b8 %v417_v33, %v417_v33 }
 0x1d2   : > { %420 = vst.msk [vmem:[%s197_s10] sm:$0x3] %vm419_vm7, %v416_v34  ;;  %421 = vst.msk [vmem:[%s197_s10 + $0x2] sm:$0x3] %vm419_vm7, %v418_v35 }
 0x1d3 PF: > { %s14_s15 = sadd.s32 1, %s556_s15  }
 0x1d4   : > { %p11_p4 = scmp.ge.s32.totalorder %s14_s15, 5  }
 0x1d6   :  { %13 = sbr.rel (!%p11_p4) target bundleno = 1 (0x1), region = 66 }

</bundles_post_ra>
